<compile_context>
chip_gen: v6e
topology: v6e:2x2x1
jax: 0.10.0
libtpu: 0.0.40
codegen_flags: <defaults>
</compile_context>

<pallas_src>
import functools

import jax
import jax.numpy as jnp
import numpy as np
from jax.experimental import pallas as pl
from jax.experimental.pallas import tpu as pltpu

QUANTIZE_FACTOR = float(1024 ** 2)
INV_Q = 1.0 / QUANTIZE_FACTOR          # power of two -> multiply is exact division
BN_EPS = 1e-5


def policy_head_kernel(p1_ref, w1_ref, coeff_ref, beta_ref, mean_ref,
                       w2_ref, b2_ref, mask2_ref, out_ref, *, W):
    """Fused ConvBlock (conv+quant+cursed_bn+relu) + policy conv (+bias, round).

    p1_ref    : (9*Cin, M)   pre-folded im2col of the input, M = B*H*W
    w1_ref    : (Cp, 9*Cin)  conv_block.conv weight, folded
    coeff/beta/mean : (Cp, 1) cursed_batchnorm per-channel params
    w2_ref    : (Co, 9*Cp)   policy conv weight, folded
    b2_ref    : (Co, 1)      policy conv bias
    mask2_ref : (9*Cp, M)    static spatial-boundary mask for conv2's im2col
    out_ref   : (Co, M)      lane-dense output (pixels on lanes)
    """
    M = p1_ref.shape[1]

    # ---- conv_block.conv : single MXU matmul over pre-folded patches ----
    acc1 = jnp.dot(w1_ref[...], p1_ref[...], preferred_element_type=jnp.float32)
    x1 = jnp.trunc(acc1 * INV_Q)                          # trunc(x / Q)

    # ---- cursed_batchnorm (exact "+ mean" order, as in reference) + ReLU ----
    x1 = jnp.trunc(((x1 + mean_ref[...]) * coeff_ref[...] + beta_ref[...]) * INV_Q)
    x1 = jnp.maximum(x1, 0.0)

    # ---- in-register im2col for the second 3x3 conv ----
    # Tap (dy, dx) needs x1 at pixel (h+dy-1, w+dx-1): a constant lane shift of
    # (dy-1)*W + (dx-1); wrap-around / out-of-board lanes are zeroed by mask2.
    taps = []
    for dy in range(3):
        for dx in range(3):
            off = (dy - 1) * W + (dx - 1)
            shift = (-off) % M
            taps.append(x1 if shift == 0 else pltpu.roll(x1, shift=shift, axis=1))
    patches2 = jnp.concatenate(taps, axis=0) * mask2_ref[...]   # (9*Cp, M)

    # ---- policy_head.conv : single MXU matmul + bias, round(x / Q) ----
    acc2 = jnp.dot(w2_ref[...], patches2, preferred_element_type=jnp.float32)
    out_ref[...] = jnp.round((acc2 + b2_ref[...]) * INV_Q)


def policy_head_forward(x_nchw, params, gather_idx):
    (w1, bn_gamma, bn_beta, bn_mean, bn_var, w2, b2) = params
    B, Cin, H, W = x_nchw.shape
    Cp = w1.shape[0]          # policy_channels
    Co = w2.shape[0]          # 80 (fixed by module)
    HW = H * W
    M = B * HW

    # ---- wrapper glue: im2col of the input (XLA-side, cheap) ----
    x_f = x_nchw.astype(jnp.float32)
    xp = jnp.pad(x_f, ((0, 0), (0, 0), (1, 1), (1, 1)))          # (B, Cin, H+2, W+2)
    taps = []
    for dy in range(3):
        for dx in range(3):
            sl = xp[:, :, dy:dy + H, dx:dx + W]                   # (B, Cin, H, W)
            taps.append(jnp.transpose(sl, (1, 0, 2, 3)).reshape(Cin, M))
    patches1 = jnp.concatenate(taps, axis=0)                      # (9*Cin, M)

    # Fold conv weights (Cout, Cin, 3, 3) -> (Cout, 9*Cin), tap-major columns.
    w1_mat = jnp.transpose(w1, (0, 2, 3, 1)).reshape(Cp, 9 * Cin).astype(jnp.float32)
    w2_mat = jnp.transpose(w2, (0, 2, 3, 1)).reshape(Co, 9 * Cp).astype(jnp.float32)

    # cursed_batchnorm fused coefficient (per-channel scalar math).
    coeff = jnp.round(bn_gamma * QUANTIZE_FACTOR / jnp.sqrt(bn_var + BN_EPS))
    coeff = coeff.reshape(Cp, 1).astype(jnp.float32)
    beta = bn_beta.reshape(Cp, 1).astype(jnp.float32)
    mean = bn_mean.reshape(Cp, 1).astype(jnp.float32)
    bias2 = b2.reshape(Co, 1).astype(jnp.float32)

    # Static spatial-boundary mask for conv2's in-kernel im2col (numpy const).
    cols = np.arange(M)
    hh = (cols % HW) // W
    ww = cols % W
    mrows = []
    for dy in range(3):
        for dx in range(3):
            ok = ((hh + dy - 1 >= 0) & (hh + dy - 1 < H) &
                  (ww + dx - 1 >= 0) & (ww + dx - 1 < W))
            mrows.append(np.broadcast_to(ok.astype(np.float32), (Cp, M)))
    mask2 = jnp.asarray(np.concatenate(mrows, axis=0))            # (9*Cp, M)

    def full(shape):
        return pl.BlockSpec(shape, lambda i, _n=len(shape): (0,) * _n)

    kernel = functools.partial(policy_head_kernel, W=W)
    out = pl.pallas_call(
        kernel,
        out_shape=jax.ShapeDtypeStruct((Co, M), jnp.float32),
        grid=(1,),
        in_specs=[full(patches1.shape), full(w1_mat.shape), full(coeff.shape),
                  full(beta.shape), full(mean.shape), full(w2_mat.shape),
                  full(bias2.shape), full(mask2.shape)],
        out_specs=full((Co, M)),
        compiler_params=pltpu.CompilerParams(dimension_semantics=("arbitrary",)),
    )(patches1, w1_mat, coeff, beta, mean, w2_mat, bias2, mask2)

    # Gather exactly like torch's NCHW x.view(B, -1).gather(dim=1, ...), but
    # with the static index table remapped once to the kernel's (Co, B*H*W)
    # layout — no output transpose needed.
    # TODO(synk): the reference loads policy_map_gather_tensor.pt and dumps
    # json / intermediate tensors to disk; file I/O and debug prints are not
    # reproduced — a deterministic synthetic gather index is used instead.
    c = gather_idx // HW
    s = gather_idx % HW
    b = jnp.arange(B, dtype=gather_idx.dtype)[:, None]
    flat_idx = c[None, :] * M + b * HW + s[None, :]               # (B, n_moves)
    return jnp.take(out.reshape(-1), flat_idx, axis=0)


if __name__ == "__main__":
    key = jax.random.PRNGKey(0)
    ks = jax.random.split(key, 8)

    # Small shapes consistent with the module: chess-like 8x8 board,
    # in_channels=8, policy_channels=8, second conv fixed at 80 channels.
    B, Cin, H, W = 2, 8, 8, 8
    Cp, Co = 8, 80
    N_MOVES = 1858  # size of the lc0->AZ policy gather in the real model

    # Deterministic, integer-valued "quantized" parameters / inputs.
    x = jnp.floor(jax.random.uniform(ks[0], (B, Cin, H, W)) * 1024.0)
    w1 = jnp.round(jax.random.uniform(ks[1], (Cp, Cin, 3, 3),
                                      minval=-1.0, maxval=1.0) * 128.0)
    bn_gamma = jax.random.uniform(ks[2], (Cp,), minval=0.5, maxval=2.0)
    bn_beta = jnp.round(jax.random.uniform(ks[3], (Cp,),
                                           minval=-1.0, maxval=1.0) * 1000.0)
    bn_mean = jnp.round(jax.random.uniform(ks[4], (Cp,), minval=-4.0, maxval=4.0))
    bn_var = jax.random.uniform(ks[5], (Cp,), minval=0.5, maxval=2.0)
    w2 = jnp.round(jax.random.uniform(ks[6], (Co, Cp, 3, 3),
                                      minval=-1.0, maxval=1.0) * 65536.0)
    b2 = jnp.round(jax.random.uniform(ks[7], (Co,),
                                      minval=-1.0, maxval=1.0) * QUANTIZE_FACTOR)

    # Deterministic stand-in for the lc0->AZ policy map (indices into C*H*W).
    gather_idx = (jnp.arange(N_MOVES, dtype=jnp.int32) * 37) % (Co * H * W)

    params = (w1, bn_gamma, bn_beta, bn_mean, bn_var, w2, b2)
    out = policy_head_forward(x, params, gather_idx)
    out = jax.block_until_ready(out)

    assert out.shape == (B, N_MOVES), out.shape
    assert bool(jnp.all(jnp.isfinite(out)))
    print("KERNEL_OK")
</pallas_src>

<mosaic_0001>
module attributes {stable_mosaic.version = 11 : i64} {
  func.func @policy_head_kernel(%arg0: i32, %arg1: memref<72x128xf32, #tpu.memory_space<vmem>>, %arg2: memref<8x72xf32, #tpu.memory_space<vmem>>, %arg3: memref<8x1xf32, #tpu.memory_space<vmem>>, %arg4: memref<8x1xf32, #tpu.memory_space<vmem>>, %arg5: memref<8x1xf32, #tpu.memory_space<vmem>>, %arg6: memref<80x72xf32, #tpu.memory_space<vmem>>, %arg7: memref<80x1xf32, #tpu.memory_space<vmem>>, %arg8: memref<72x128xf32, #tpu.memory_space<vmem>>, %arg9: memref<80x128xf32, #tpu.memory_space<vmem>>) attributes {dimension_semantics = [#tpu.dimension_semantics<arbitrary>], iteration_bounds = array<i64: 1>, scalar_prefetch = 0 : i64, scratch_operands = 0 : i64, tpu.core_type = #tpu.core_type<tc>, window_params = [{pipeline_mode = #tpu.pipeline_mode<synchronous>, transform_indices = @transform_0, window_bounds = array<i64: 72, 128>}, {pipeline_mode = #tpu.pipeline_mode<synchronous>, transform_indices = @transform_1, window_bounds = array<i64: 8, 72>}, {pipeline_mode = #tpu.pipeline_mode<synchronous>, transform_indices = @transform_2, window_bounds = array<i64: 8, 1>}, {pipeline_mode = #tpu.pipeline_mode<synchronous>, transform_indices = @transform_3, window_bounds = array<i64: 8, 1>}, {pipeline_mode = #tpu.pipeline_mode<synchronous>, transform_indices = @transform_4, window_bounds = array<i64: 8, 1>}, {pipeline_mode = #tpu.pipeline_mode<synchronous>, transform_indices = @transform_5, window_bounds = array<i64: 80, 72>}, {pipeline_mode = #tpu.pipeline_mode<synchronous>, transform_indices = @transform_6, window_bounds = array<i64: 80, 1>}, {pipeline_mode = #tpu.pipeline_mode<synchronous>, transform_indices = @transform_7, window_bounds = array<i64: 72, 128>}, {pipeline_mode = #tpu.pipeline_mode<synchronous>, transform_indices = @transform_8, window_bounds = array<i64: 80, 128>}]} {
    %c0 = arith.constant 0 : index
    %c0_0 = arith.constant 0 : index
    %0 = vector.load %arg2[%c0, %c0_0] : memref<8x72xf32, #tpu.memory_space<vmem>>, vector<8x72xf32>
    %c0_1 = arith.constant 0 : index
    %c0_2 = arith.constant 0 : index
    %1 = vector.load %arg1[%c0_1, %c0_2] : memref<72x128xf32, #tpu.memory_space<vmem>>, vector<72x128xf32>
    %cst = arith.constant dense<0.000000e+00> : vector<8x128xf32>
    %2 = tpu.matmul %0, %1, %cst {dimension_numbers = #tpu.dot_dimension_numbers<[1], [0], [0], [1], [0, 0, 1, 1], [], []>} : vector<8x72xf32>, vector<72x128xf32>, vector<8x128xf32> -> vector<8x128xf32>
    %cst_3 = arith.constant 9.53674316E-7 : f32
    %3 = vector.broadcast %cst_3 : f32 to vector<8x128xf32>
    %4 = arith.mulf %2, %3 : vector<8x128xf32>
    %cst_4 = arith.constant 0.000000e+00 : f32
    %5 = vector.broadcast %cst_4 : f32 to vector<8x128xf32>
    %6 = arith.cmpf olt, %4, %5 : vector<8x128xf32>
    %7 = math.ceil %4 : vector<8x128xf32>
    %8 = math.floor %4 : vector<8x128xf32>
    %9 = arith.select %6, %7, %8 : vector<8x128xi1>, vector<8x128xf32>
    %c0_5 = arith.constant 0 : index
    %c0_6 = arith.constant 0 : index
    %10 = vector.load %arg5[%c0_5, %c0_6] : memref<8x1xf32, #tpu.memory_space<vmem>>, vector<8x1xf32>
    %11 = vector.broadcast %10 : vector<8x1xf32> to vector<8x128xf32>
    %12 = arith.addf %9, %11 : vector<8x128xf32>
    %c0_7 = arith.constant 0 : index
    %c0_8 = arith.constant 0 : index
    %13 = vector.load %arg3[%c0_7, %c0_8] : memref<8x1xf32, #tpu.memory_space<vmem>>, vector<8x1xf32>
    %14 = vector.broadcast %13 : vector<8x1xf32> to vector<8x128xf32>
    %15 = arith.mulf %12, %14 : vector<8x128xf32>
    %c0_9 = arith.constant 0 : index
    %c0_10 = arith.constant 0 : index
    %16 = vector.load %arg4[%c0_9, %c0_10] : memref<8x1xf32, #tpu.memory_space<vmem>>, vector<8x1xf32>
    %17 = vector.broadcast %16 : vector<8x1xf32> to vector<8x128xf32>
    %18 = arith.addf %15, %17 : vector<8x128xf32>
    %cst_11 = arith.constant 9.53674316E-7 : f32
    %19 = vector.broadcast %cst_11 : f32 to vector<8x128xf32>
    %20 = arith.mulf %18, %19 : vector<8x128xf32>
    %cst_12 = arith.constant 0.000000e+00 : f32
    %21 = vector.broadcast %cst_12 : f32 to vector<8x128xf32>
    %22 = arith.cmpf olt, %20, %21 : vector<8x128xf32>
    %23 = math.ceil %20 : vector<8x128xf32>
    %24 = math.floor %20 : vector<8x128xf32>
    %25 = arith.select %22, %23, %24 : vector<8x128xi1>, vector<8x128xf32>
    %cst_13 = arith.constant 0.000000e+00 : f32
    %26 = vector.broadcast %cst_13 : f32 to vector<8x128xf32>
    %27 = arith.maximumf %25, %26 : vector<8x128xf32>
    %c9_i32 = arith.constant 9 : i32
    %28 = tpu.dynamic_rotate %27 by %c9_i32 dim 1 : vector<8x128xf32>, i32 -> vector<8x128xf32>
    %c8_i32 = arith.constant 8 : i32
    %29 = tpu.dynamic_rotate %27 by %c8_i32 dim 1 : vector<8x128xf32>, i32 -> vector<8x128xf32>
    %c7_i32 = arith.constant 7 : i32
    %30 = tpu.dynamic_rotate %27 by %c7_i32 dim 1 : vector<8x128xf32>, i32 -> vector<8x128xf32>
    %c1_i32 = arith.constant 1 : i32
    %31 = tpu.dynamic_rotate %27 by %c1_i32 dim 1 : vector<8x128xf32>, i32 -> vector<8x128xf32>
    %c127_i32 = arith.constant 127 : i32
    %32 = tpu.dynamic_rotate %27 by %c127_i32 dim 1 : vector<8x128xf32>, i32 -> vector<8x128xf32>
    %c121_i32 = arith.constant 121 : i32
    %33 = tpu.dynamic_rotate %27 by %c121_i32 dim 1 : vector<8x128xf32>, i32 -> vector<8x128xf32>
    %c120_i32 = arith.constant 120 : i32
    %34 = tpu.dynamic_rotate %27 by %c120_i32 dim 1 : vector<8x128xf32>, i32 -> vector<8x128xf32>
    %c119_i32 = arith.constant 119 : i32
    %35 = tpu.dynamic_rotate %27 by %c119_i32 dim 1 : vector<8x128xf32>, i32 -> vector<8x128xf32>
    %36 = tpu.concatenate %28, %29, %30, %31, %27, %32, %33, %34, %35 in 0 : vector<8x128xf32>, vector<8x128xf32>, vector<8x128xf32>, vector<8x128xf32>, vector<8x128xf32>, vector<8x128xf32>, vector<8x128xf32>, vector<8x128xf32>, vector<8x128xf32> -> vector<72x128xf32>
    %c0_14 = arith.constant 0 : index
    %c0_15 = arith.constant 0 : index
    %37 = vector.load %arg8[%c0_14, %c0_15] : memref<72x128xf32, #tpu.memory_space<vmem>>, vector<72x128xf32>
    %38 = arith.mulf %36, %37 : vector<72x128xf32>
    %c0_16 = arith.constant 0 : index
    %c0_17 = arith.constant 0 : index
    %39 = vector.load %arg6[%c0_16, %c0_17] : memref<80x72xf32, #tpu.memory_space<vmem>>, vector<80x72xf32>
    %cst_18 = arith.constant dense<0.000000e+00> : vector<80x128xf32>
    %40 = tpu.matmul %39, %38, %cst_18 {dimension_numbers = #tpu.dot_dimension_numbers<[1], [0], [0], [1], [0, 0, 1, 1], [], []>} : vector<80x72xf32>, vector<72x128xf32>, vector<80x128xf32> -> vector<80x128xf32>
    %c0_19 = arith.constant 0 : index
    %c0_20 = arith.constant 0 : index
    %41 = vector.load %arg7[%c0_19, %c0_20] : memref<80x1xf32, #tpu.memory_space<vmem>>, vector<80x1xf32>
    %42 = vector.broadcast %41 : vector<80x1xf32> to vector<80x128xf32>
    %43 = arith.addf %40, %42 : vector<80x128xf32>
    %cst_21 = arith.constant 9.53674316E-7 : f32
    %44 = vector.broadcast %cst_21 : f32 to vector<80x128xf32>
    %45 = arith.mulf %43, %44 : vector<80x128xf32>
    %46 = math.roundeven %45 : vector<80x128xf32>
    %c0_22 = arith.constant 0 : index
    %c0_23 = arith.constant 0 : index
    %47 = vector.load %arg9[%c0_22, %c0_23] : memref<80x128xf32, #tpu.memory_space<vmem>>, vector<80x128xf32>
    tpu.vector_store %arg9[%c0_22, %c0_23], %46 {strides = array<i32>} : memref<80x128xf32, #tpu.memory_space<vmem>>, vector<80x128xf32>,
    return
  }
  func.func @transform_0(%arg0: i32) -> (i32, i32) {
    %c0_i32 = arith.constant 0 : i32
    %c0_i32_0 = arith.constant 0 : i32
    %c0_i32_1 = arith.constant 0 : i32
    return %c0_i32, %c0_i32_0 : i32, i32
  }
  func.func @transform_1(%arg0: i32) -> (i32, i32) {
    %c0_i32 = arith.constant 0 : i32
    %c0_i32_0 = arith.constant 0 : i32
    %c0_i32_1 = arith.constant 0 : i32
    return %c0_i32, %c0_i32_0 : i32, i32
  }
  func.func @transform_2(%arg0: i32) -> (i32, i32) {
    %c0_i32 = arith.constant 0 : i32
    %c0_i32_0 = arith.constant 0 : i32
    %c0_i32_1 = arith.constant 0 : i32
    return %c0_i32, %c0_i32_0 : i32, i32
  }
  func.func @transform_3(%arg0: i32) -> (i32, i32) {
    %c0_i32 = arith.constant 0 : i32
    %c0_i32_0 = arith.constant 0 : i32
    %c0_i32_1 = arith.constant 0 : i32
    return %c0_i32, %c0_i32_0 : i32, i32
  }
  func.func @transform_4(%arg0: i32) -> (i32, i32) {
    %c0_i32 = arith.constant 0 : i32
    %c0_i32_0 = arith.constant 0 : i32
    %c0_i32_1 = arith.constant 0 : i32
    return %c0_i32, %c0_i32_0 : i32, i32
  }
  func.func @transform_5(%arg0: i32) -> (i32, i32) {
    %c0_i32 = arith.constant 0 : i32
    %c0_i32_0 = arith.constant 0 : i32
    %c0_i32_1 = arith.constant 0 : i32
    return %c0_i32, %c0_i32_0 : i32, i32
  }
  func.func @transform_6(%arg0: i32) -> (i32, i32) {
    %c0_i32 = arith.constant 0 : i32
    %c0_i32_0 = arith.constant 0 : i32
    %c0_i32_1 = arith.constant 0 : i32
    return %c0_i32, %c0_i32_0 : i32, i32
  }
  func.func @transform_7(%arg0: i32) -> (i32, i32) {
    %c0_i32 = arith.constant 0 : i32
    %c0_i32_0 = arith.constant 0 : i32
    %c0_i32_1 = arith.constant 0 : i32
    return %c0_i32, %c0_i32_0 : i32, i32
  }
  func.func @transform_8(%arg0: i32) -> (i32, i32) {
    %c0_i32 = arith.constant 0 : i32
    %c0_i32_0 = arith.constant 0 : i32
    %c0_i32_1 = arith.constant 0 : i32
    return %c0_i32, %c0_i32_0 : i32, i32
  }
}

</mosaic_0001>

<bundles_post_ra>
// kernel: tpu_custom_call.1
= control target key start
LH: loop header
LB: loop body
LE: loop exit
PB: predicated region body
PF: predicated region fallthrough
CT: control target
= control target key end

     0   :  { %v652_v1 = vmov 0.0   ;;  %vm653_vm0 = vmmov 0   ;;  %v654_v3 = vmov 0   ;;  %s870_s0 = inlined_call_operand.vmem [shape: f32[72,128], index: 0, kind: input, shape index: {}]   ;;  %s871_s1 = inlined_call_operand.vmem [shape: f32[8,72], index: 1, kind: input, shape index: {}]   ;;  %s872_s2 = inlined_call_operand.vmem [shape: f32[8,1], index: 2, kind: input, shape index: {}]   ;;  %s873_s3 = inlined_call_operand.vmem [shape: f32[8,1], index: 3, kind: input, shape index: {}]   ;;  %s874_s4 = inlined_call_operand.vmem [shape: f32[8,1], index: 4, kind: input, shape index: {}]   ;;  %s875_s5 = inlined_call_operand.vmem [shape: f32[80,72], index: 5, kind: input, shape index: {}]   ;;  %s876_s6 = inlined_call_operand.vmem [shape: f32[80,1], index: 6, kind: input, shape index: {}]   ;;  %s877_s7 = inlined_call_operand.vmem [shape: f32[72,128], index: 7, kind: input, shape index: {}]   ;;  %s878_s8 = inlined_call_operand.hbm [shape: f32[80,128], index: 8, kind: output, shape index: {}]  }
   0x1   :  { %v39_v0 = vld [vmem:[%s870_s0 + $0x40] sm:$0xff]  ;;  %481 = vmatprep.subr.mxu0 %v652_v1  ;;  %v38_v2 = vld [vmem:[%s870_s0 + $0x38] sm:$0xff]  ;;  %499 = vmatprep.mubr.msk.f32.mxu0 %vm653_vm0, %v652_v1  ;;  %v37_v4 = vld [vmem:[%s870_s0 + $0x30] sm:$0xff] }
   0x2   :  { %482 = vmatpush3.msra.mxu0 %v39_v0  ;;  %628 = vset.pattern.permute.xlu0 %v654_v3  ;;  %v119_v5 = vld [vmem:[%s874_s4] sm:$0xff] }
   0x3   :  { %483 = vmatprep.subr.mxu0 %v652_v1  ;;  %629 = vset.pattern.permute.xlu1 %v654_v3  ;;  %v133_v6 = vld [vmem:[%s873_s3] sm:$0xff] }
   0x4   :  { %484 = vmatpush3.msra.mxu0 %v38_v2  ;;  %122 = vperm.xlu0 %628, %v119_v5  }
   0x5   :  { %13 = vsyncpa [#allocation3], 0  ;;  %485 = vmatprep.subr.mxu0 %v652_v1  ;;  %v36_v7 = vld [vmem:[%s870_s0 + $0x28] sm:$0xff]  ;;  %v126_v8 = vld [vmem:[%s872_s2] sm:$0xff]  ;;  %136 = vperm.xlu1 %629, %v133_v6   ;;  %vm40_vm1 = vcmask 588800   ;;  %s657_s28 = smov 127  }
   0x6   :  { %486 = vmatpush3.msra.mxu0 %v37_v4  ;;  %v35_v9 = vld [vmem:[%s870_s0 + $0x20] sm:$0xff]  ;;  %v34_v10 = vld [vmem:[%s870_s0 + $0x18] sm:$0xff]  ;;  %v33_v11 = vld [vmem:[%s870_s0 + $0x10] sm:$0xff]  ;;  %s658_s29 = smov 121   ;;  %s659_s10 = smov 7  }
   0x7   :  { %487 = vmatprep.subr.mxu0 %v652_v1  ;;  %v32_v12 = vld [vmem:[%s870_s0 + $0x8] sm:$0xff]  ;;  %v31_v13 = vld [vmem:[%s870_s0] sm:$0xff]  ;;  %s655_s0 = smov 120   ;;  %s660_s11 = smov 1   ;;  %v193_v35 = vld [vmem:[%s876_s6 + $0x18] sm:$0xff] }
   0x8   :  { %488 = vmatpush3.msra.mxu0 %v36_v7  ;;  %129 = vperm.xlu0 %628, %v126_v8   ;;  %v30_v14 = vld [vmem:[%s871_s1] sm:$0xff]  ;;  %s656_s1 = smov 119   ;;  %s661_s12 = smov 9   ;;  %v191_v33 = vld [vmem:[%s876_s6 + $0x8] sm:$0xff]  ;;  %v192_v36 = vld [vmem:[%s876_s6 + $0x10] sm:$0xff] }
   0x9   :  { %489 = vmatprep.subr.mxu0 %v652_v1  ;;  %v180_v32 = vld [vmem:[%s875_s5] sm:$0xff]  ;;  %s662_s13 = smov 8   ;;  %v195_v37 = vld [vmem:[%s876_s6 + $0x28] sm:$0xff]  ;;  %v197_v39 = vld [vmem:[%s876_s6 + $0x38] sm:$0xff] }
   0xa   :  { %490 = vmatpush3.msra.mxu0 %v35_v9  ;;  %520 = vmatprep.mubr.msk.f32.mxu1 %vm40_vm1, %v180_v32  ;;  %v190_v34 = vld [vmem:[%s876_s6] sm:$0xff]  ;;  %v196_v40 = vld [vmem:[%s876_s6 + $0x30] sm:$0xff]  ;;  %v199_v41 = vld [vmem:[%s876_s6 + $0x48] sm:$0xff] }
   0xb   :  { %491 = vmatprep.subr.mxu0 %v652_v1  ;;  %v194_v38 = vld [vmem:[%s876_s6 + $0x20] sm:$0xff]  ;;  %v169_v44 = vld [vmem:[%s877_s7 + $0x38] sm:$0xff]  ;;  %v168_v48 = vld [vmem:[%s877_s7 + $0x30] sm:$0xff] }
   0xc   :  { %492 = vmatpush3.msra.mxu0 %v34_v10  ;;  %v198_v42 = vld [vmem:[%s876_s6 + $0x40] sm:$0xff]  ;;  %v167_v50 = vld [vmem:[%s877_s7 + $0x28] sm:$0xff]  ;;  %v165_v57 = vld [vmem:[%s877_s7 + $0x18] sm:$0xff] }
   0xd   :  { %493 = vmatprep.subr.mxu0 %v652_v1  ;;  %v170_v43 = vld [vmem:[%s877_s7 + $0x40] sm:$0xff]  ;;  %v164_v60 = vld [vmem:[%s877_s7 + $0x10] sm:$0xff]  ;;  %v163_v62 = vld [vmem:[%s877_s7 + $0x8] sm:$0xff] }
   0xe   :  { %494 = vmatpush3.msra.mxu0 %v33_v11  ;;  %v166_v54 = vld [vmem:[%s877_s7 + $0x20] sm:$0xff]  ;;  %v181_v5 = vld [vmem:[%s875_s5 + $0x8] sm:$0xff]  ;;  %v182_v6 = vld [vmem:[%s875_s5 + $0x10] sm:$0xff] }
   0xf   :  { %495 = vmatprep.subr.mxu0 %v652_v1  ;;  %v183_v7 = vld [vmem:[%s875_s5 + $0x18] sm:$0xff]  ;;  %v184_v8 = vld [vmem:[%s875_s5 + $0x20] sm:$0xff]  ;;  %v185_v9 = vld [vmem:[%s875_s5 + $0x28] sm:$0xff] }
  0x10   :  { %496 = vmatpush3.msra.mxu0 %v32_v12  ;;  %v186_v10 = vld [vmem:[%s875_s5 + $0x30] sm:$0xff]  ;;  %v187_v11 = vld [vmem:[%s875_s5 + $0x38] sm:$0xff]  ;;  %v188_v12 = vld [vmem:[%s875_s5 + $0x40] sm:$0xff] }
  0x11   :  { %497 = vmatprep.subr.mxu0 %v652_v1  ;;  %v162_v1 = vld [vmem:[%s877_s7] sm:$0xff] }
  0x12   :  { %498 = vmatpush3.msra.mxu0 %v31_v13  ;;  %v189_v13 = vld [vmem:[%s875_s5 + $0x48] sm:$0xff]  ;;  %s663_s5 = smov [#allocation2]  }
  0x13   :  { %500 = vmatmul.mubr.msk.f32.vlgmr.msra.gmra.mxu0 %vm40_vm1, %v30_v14  ;;  %s430_s15 = sshll.u32 %s663_s5, 4  ;;  %s431_s15 = int_to_ptr.vmem [resolvable:$true] %s430_s15 }
  0x14   :  { %s630_s16 = scalar_lea.vmem %s431_s15, 1280  ;;  %p635_p1 = scmp.lt.s32.totalorder %s431_s15, %s431_s15 }
  0x15   :  { %p631_p0 = scmp.ne.s32.totalorder %s431_s15, %s630_s16  ;;  %p636_p2 = scmp.lt.s32.totalorder %s630_s16, %s630_s16 }
  0x17   :  { %p637_p3 = por %p636_p2, %p635_p1 }
  0x19   :  { %p638_p4 = pnand %p637_p3, %p631_p0 }
  0x7f   :  { %v123_v16 = vpop.permute.xlu0 %122 }
  0x80   :  { %v137_v24 = vpop.permute.xlu1 %136 }
  0x83   :  { %v130_v23 = vpop.permute.xlu0 %129 }
  0xd3   :  { %v110_v15 = vpop.f32.mrf.mxu0 }
  0xd4   :  { %v114_v17 = vmul.f32 9.536743e-07, %v110_v15 }
  0xd5   :  { %v501_v18 = vpop.f32.mrf.mxu0 }
  0xd6   :  { %vm115_vm2 = vcmp.lt.f32.partialorder %v114_v17, 0.0  ;;  %v116_v19 = vceil.f32 %v114_v17  ;;  %v117_v20 = vfloor.f32 %v114_v17 }
  0xd8   :  { %v118_v21 = vsel %vm115_vm2, %v116_v19, %v117_v20 }
  0xd9   :  { %v125_v22 = vadd.f32 %v123_v16, %v118_v21 }
  0xdb   :  { %v132_v25 = vmul.f32 %v130_v23, %v125_v22 }
  0xdd   :  { %v139_v26 = vadd.f32 %v137_v24, %v132_v25 }
  0xdf   :  { %v140_v27 = vmul.f32 9.536743e-07, %v139_v26 }
  0xe1   :  { %vm141_vm3 = vcmp.lt.f32.partialorder %v140_v27, 0.0  ;;  %v142_v28 = vceil.f32 %v140_v27  ;;  %v143_v29 = vfloor.f32 %v140_v27 }
  0xe3   :  { %v144_v30 = vsel %vm141_vm3, %v142_v28, %v143_v29 }
  0xe4   :  { %v145_v31 = vmax.f32 %v144_v30, 0.0 }
  0xe6   :  { %158 = vrot.lane.b32.xlu0 %v145_v31, %s655_s0  ;;  %160 = vrot.lane.b32.xlu1 %v145_v31, %s656_s1  ;;  %v175_v59 = vmul.f32 %v166_v54, %v145_v31 }
  0xea   :  { %154 = vrot.lane.b32.xlu0 %v145_v31, %s657_s28  ;;  %156 = vrot.lane.b32.xlu1 %v145_v31, %s658_s29 }
  0xee   :  { %150 = vrot.lane.b32.xlu0 %v145_v31, %s659_s10  ;;  %152 = vrot.lane.b32.xlu1 %v145_v31, %s660_s11 }
  0xf2   :  { %146 = vrot.lane.b32.xlu0 %v145_v31, %s661_s12  ;;  %148 = vrot.lane.b32.xlu1 %v145_v31, %s662_s13 }
  0xf6   :  { %207 = vperm.xlu0 %628, %v191_v33   ;;  %202 = vperm.xlu1 %629, %v190_v34  }
  0xfa   :  { %217 = vperm.xlu0 %628, %v193_v35   ;;  %212 = vperm.xlu1 %629, %v192_v36  }
  0xfe   :  { %227 = vperm.xlu0 %628, %v195_v37   ;;  %222 = vperm.xlu1 %629, %v194_v38  }
 0x102   :  { %237 = vperm.xlu0 %628, %v197_v39   ;;  %232 = vperm.xlu1 %629, %v196_v40  }
 0x106   :  { %247 = vperm.xlu0 %628, %v199_v41   ;;  %242 = vperm.xlu1 %629, %v198_v42  }
 0x158   :  { %v159_v45 = vpop.permute.xlu0 %158  ;;  %v161_v46 = vpop.permute.xlu1 %160 }
 0x159   :  { %v179_v47 = vmul.f32 %v170_v43, %v161_v46  ;;  %v178_v49 = vmul.f32 %v169_v44, %v159_v45 }
 0x15b   :  { %502 = vmatprep.subr.mxu1 %v179_v47 }
 0x15c   :  { %v155_v51 = vpop.permute.xlu0 %154  ;;  %503 = vmatpush3.msra.mxu1 %v179_v47  ;;  %v157_v52 = vpop.permute.xlu1 %156 }
 0x15d   :  { %v177_v53 = vmul.f32 %v168_v48, %v157_v52  ;;  %504 = vmatprep.subr.mxu1 %v178_v49  ;;  %v176_v55 = vmul.f32 %v167_v50, %v155_v51 }
 0x15e   :  { %505 = vmatpush3.msra.mxu1 %v178_v49 }
 0x15f   :  { %506 = vmatprep.subr.mxu1 %v177_v53 }
 0x160   :  { %v151_v56 = vpop.permute.xlu0 %150  ;;  %507 = vmatpush3.msra.mxu1 %v177_v53  ;;  %v153_v58 = vpop.permute.xlu1 %152 }
 0x161   :  { %508 = vmatprep.subr.mxu1 %v176_v55  ;;  %v174_v61 = vmul.f32 %v165_v57, %v153_v58  ;;  %v173_v0 = vmul.f32 %v164_v60, %v151_v56 }
 0x162   :  { %509 = vmatpush3.msra.mxu1 %v176_v55 }
 0x163   :  { %510 = vmatprep.subr.mxu1 %v175_v59 }
 0x164   :  { %v149_v63 = vpop.permute.xlu1 %148  ;;  %511 = vmatpush3.msra.mxu1 %v175_v59  ;;  %v147_v2 = vpop.permute.xlu0 %146 }
 0x165   :  { %512 = vmatprep.subr.mxu1 %v174_v61  ;;  %v172_v3 = vmul.f32 %v163_v62, %v149_v63  ;;  %v171_v4 = vmul.f32 %v162_v1, %v147_v2 }
 0x166   :  { %513 = vmatpush3.msra.mxu1 %v174_v61 }
 0x167   :  { %514 = vmatprep.subr.mxu1 %v173_v0 }
 0x168   :  { %515 = vmatpush3.msra.mxu1 %v173_v0 }
 0x169   :  { %516 = vmatprep.subr.mxu1 %v172_v3 }
 0x16a   :  { %517 = vmatpush3.msra.mxu1 %v172_v3 }
 0x16b   :  { %518 = vmatprep.subr.mxu1 %v171_v4 }
 0x16c   :  { %519 = vmatpush3.msra.mxu1 %v171_v4 }
 0x16d   :  { %521 = vmatmul.mubr.msk.f32.vlgmr.msra.gmra.mxu1 %vm40_vm1, %v181_v5 }
 0x16e   :  { %523 = vmatprep.mubr.msk.f32.mxu1 %vm40_vm1, %v182_v6 }
 0x171   :  { %524 = vmatmul.mubr.msk.f32.gmra.mxu1 %vm40_vm1, %v183_v7  ;;  %v208_v14 = vpop.permute.xlu0 %207  ;;  %v203_v15 = vpop.permute.xlu1 %202 }
 0x172   :  { %526 = vmatprep.mubr.msk.f32.mxu1 %vm40_vm1, %v184_v8 }
 0x175   :  { %527 = vmatmul.mubr.msk.f32.gmra.mxu1 %vm40_vm1, %v185_v9  ;;  %v218_v16 = vpop.permute.xlu0 %217  ;;  %v213_v22 = vpop.permute.xlu1 %212 }
 0x176   :  { %529 = vmatprep.mubr.msk.f32.mxu1 %vm40_vm1, %v186_v10 }
 0x179   :  { %530 = vmatmul.mubr.msk.f32.gmra.mxu1 %vm40_vm1, %v187_v11  ;;  %v228_v26 = vpop.permute.xlu0 %227  ;;  %v223_v40 = vpop.permute.xlu1 %222 }
 0x17a   :  { %532 = vmatprep.mubr.msk.f32.mxu1 %vm40_vm1, %v188_v12 }
 0x17d   :  { %533 = vmatmul.mubr.msk.f32.gmra.mxu1 %vm40_vm1, %v189_v13  ;;  %v238_v50 = vpop.permute.xlu0 %237  ;;  %v233_v4 = vpop.permute.xlu1 %232 }
 0x22d   :  { %v522_v17 = vpop.f32.mrf.mxu1 }
 0x22e   :  { %v352_v18 = vadd.f32 %v522_v17, %v208_v14  ;;  %v248_v14 = vpop.permute.xlu0 %247 }
 0x22f   :  { %v346_v19 = vpop.f32.mrf.mxu1 }
 0x230   :  { %v396_v20 = vmul.f32 9.536743e-07, %v352_v18  ;;  %v347_v21 = vadd.f32 %v346_v19, %v203_v15 }
 0x231   :  { %v525_v23 = vpop.f32.mrf.mxu1 }
 0x232   :  { %v545_v24 = vcvt.f32.s32 %v396_v20  ;;  %v395_v25 = vmul.f32 9.536743e-07, %v347_v21  ;;  %v362_v27 = vadd.f32 %v525_v23, %v218_v16  ;;  %v543_v31 = vand.u32 2147483647, %v396_v20 }
 0x233   :  { %v356_v28 = vpop.f32.mrf.mxu1  ;;  %v548_v37 = vand.u32 2147483648, %v396_v20 }
 0x234   :  { %v546_v29 = vcvt.s32.f32 %v545_v24  ;;  %v537_v30 = vcvt.f32.s32 %v395_v25  ;;  %v535_v32 = vand.u32 2147483647, %v395_v25  ;;  %v398_v33 = vmul.f32 9.536743e-07, %v362_v27 }
 0x235   :  { %v357_v34 = vadd.f32 %v356_v28, %v213_v22  ;;  %v528_v35 = vpop.f32.mrf.mxu1  ;;  %v540_v41 = vand.u32 2147483648, %v395_v25  ;;  %vm544_vm4 = vcmp.lt.f32.partialorder %v543_v31, 8388608.0 }
 0x236   :  { %v547_v36 = vand.u32 2147483647, %v546_v29  ;;  %v538_v38 = vcvt.s32.f32 %v537_v30  ;;  %v372_v39 = vadd.f32 %v528_v35, %v228_v26  ;;  %v559_v42 = vand.u32 2147483647, %v398_v33 }
 0x237   :  { %v561_v43 = vcvt.f32.s32 %v398_v33  ;;  %v397_v44 = vmul.f32 9.536743e-07, %v357_v34  ;;  %v366_v45 = vpop.f32.mrf.mxu1  ;;  %vm848_vm5 = vcmp.lt.f32.partialorder %v535_v32, 8388608.0  ;;  %v564_v58 = vand.u32 2147483648, %v398_v33  ;;  %v243_v32 = vpop.permute.xlu1 %242 }
 0x238   :  { %v549_v46 = vor.u32 %v548_v37, %v547_v36  ;;  %v539_v47 = vand.u32 2147483647, %v538_v38  ;;  %v400_v48 = vmul.f32 9.536743e-07, %v372_v39  ;;  %v367_v49 = vadd.f32 %v366_v45, %v223_v40 }
 0x239   :  { %v562_v52 = vcvt.s32.f32 %v561_v43  ;;  %v553_v53 = vcvt.f32.s32 %v397_v44  ;;  %v531_v54 = vpop.f32.mrf.mxu1  ;;  %vm852_vm6 = vcmp.lt.f32.partialorder %v559_v42, 8388608.0  ;;  %v551_v60 = vand.u32 2147483647, %v397_v44 }
 0x23a   :  { %v550_v55 = vsel %vm544_vm4, %v549_v46, %v396_v20  ;;  %v541_v56 = vor.u32 %v540_v41, %v539_v47  ;;  %v577_v62 = vcvt.f32.s32 %v400_v48  ;;  %v556_v1 = vand.u32 2147483648, %v397_v44 }
 0x23b   :  { %416 = vst [vmem:[#allocation2 + $0x8] sm:$0xff] %v550_v55  ;;  %v563_v59 = vand.u32 2147483647, %v562_v52  ;;  %v554_v61 = vcvt.s32.f32 %v553_v53  ;;  %v376_v63 = vpop.f32.mrf.mxu1  ;;  %v575_v2 = vand.u32 2147483647, %v400_v48  ;;  %v399_v3 = vmul.f32 9.536743e-07, %v367_v49 }
 0x23c   :  { %v542_v0 = vsel %vm848_vm5, %v541_v56, %v395_v25  ;;  %v578_v7 = vcvt.s32.f32 %v577_v62  ;;  %v382_v8 = vadd.f32 %v531_v54, %v238_v50  ;;  %v580_v10 = vand.u32 2147483648, %v400_v48 }
 0x23d   :  { %415 = vst [vmem:[#allocation2] sm:$0xff] %v542_v0  ;;  %v565_v5 = vor.u32 %v564_v58, %v563_v59  ;;  %v555_v6 = vand.u32 2147483647, %v554_v61  ;;  %v534_v9 = vpop.f32.mrf.mxu1  ;;  %v567_v11 = vand.u32 2147483647, %v399_v3  ;;  %v569_v12 = vcvt.f32.s32 %v399_v3 }
 0x23e   :  { %v377_v13 = vadd.f32 %v376_v63, %v233_v4  ;;  %v579_v17 = vand.u32 2147483647, %v578_v7  ;;  %v402_v18 = vmul.f32 9.536743e-07, %v382_v8  ;;  %vm552_vm7 = vcmp.lt.f32.partialorder %v551_v60, 8388608.0 }
 0x23f   :  { %v566_v15 = vsel %vm852_vm6, %v565_v5, %v398_v33  ;;  %v557_v16 = vor.u32 %v556_v1, %v555_v6  ;;  %v570_v19 = vcvt.s32.f32 %v569_v12  ;;  %v392_v21 = vadd.f32 %v534_v9, %v248_v14  ;;  %v386_v28 = vpop.f32.mrf.mxu1 }
 0x240   :  { %418 = vst [vmem:[#allocation2 + $0x18] sm:$0xff] %v566_v15  ;;  %v401_v20 = vmul.f32 9.536743e-07, %v377_v13  ;;  %v581_v23 = vor.u32 %v580_v10, %v579_v17  ;;  %v593_v24 = vcvt.f32.s32 %v402_v18  ;;  %vm576_vm8 = vcmp.lt.f32.partialorder %v575_v2, 8388608.0 }
 0x241   :  { %v558_v22 = vsel %vm552_vm7, %v557_v16, %v397_v44  ;;  %v571_v25 = vand.u32 2147483647, %v570_v19  ;;  %v572_v26 = vand.u32 2147483648, %v399_v3  ;;  %vm860_vm9 = vcmp.lt.f32.partialorder %v567_v11, 8388608.0 }
 0x242   :  { %417 = vst [vmem:[#allocation2 + $0x10] sm:$0xff] %v558_v22  ;;  %v585_v27 = vcvt.f32.s32 %v401_v20  ;;  %v582_v29 = vsel %vm576_vm8, %v581_v23, %v400_v48  ;;  %v594_v31 = vcvt.s32.f32 %v593_v24  ;;  %v591_v34 = vand.u32 2147483647, %v402_v18 }
 0x243   :  { %420 = vst [vmem:[#allocation2 + $0x28] sm:$0xff] %v582_v29  ;;  %v573_v33 = vor.u32 %v572_v26, %v571_v25  ;;  %v404_v36 = vmul.f32 9.536743e-07, %v392_v21  ;;  %v596_v38 = vand.u32 2147483648, %v402_v18  ;;  %v583_v39 = vand.u32 2147483647, %v401_v20 }
 0x244   :  { %v586_v35 = vcvt.s32.f32 %v585_v27  ;;  %v595_v37 = vand.u32 2147483647, %v594_v31  ;;  %v387_v40 = vadd.f32 %v386_v28, %v243_v32  ;;  %v588_v43 = vand.u32 2147483648, %v401_v20 }
 0x245   :  { %v574_v41 = vsel %vm860_vm9, %v573_v33, %v399_v3  ;;  %v609_v44 = vcvt.f32.s32 %v404_v36  ;;  %vm592_vm10 = vcmp.lt.f32.partialorder %v591_v34, 8388608.0  ;;  %vm584_vm11 = vcmp.lt.f32.partialorder %v583_v39, 8388608.0 }
 0x246   :  { %v587_v42 = vand.u32 2147483647, %v586_v35  ;;  %419 = vst [vmem:[#allocation2 + $0x20] sm:$0xff] %v574_v41  ;;  %v597_v45 = vor.u32 %v596_v38, %v595_v37  ;;  %v403_v46 = vmul.f32 9.536743e-07, %v387_v40  ;;  %v607_v50 = vand.u32 2147483647, %v404_v36 }
 0x247   :  { %v610_v48 = vcvt.s32.f32 %v609_v44  ;;  %v612_v54 = vand.u32 2147483648, %v404_v36 }
 0x248   :  { %v589_v47 = vor.u32 %v588_v43, %v587_v42  ;;  %v598_v49 = vsel %vm592_vm10, %v597_v45, %v402_v18  ;;  %v601_v51 = vcvt.f32.s32 %v403_v46  ;;  %v599_v57 = vand.u32 2147483647, %v403_v46 }
 0x249   :  { %422 = vst [vmem:[#allocation2 + $0x38] sm:$0xff] %v598_v49  ;;  %v611_v53 = vand.u32 2147483647, %v610_v48  ;;  %vm608_vm12 = vcmp.lt.f32.partialorder %v607_v50, 8388608.0  ;;  %v604_v59 = vand.u32 2147483648, %v403_v46 }
 0x24a   :  { %v590_v52 = vsel %vm584_vm11, %v589_v47, %v401_v20  ;;  %v602_v55 = vcvt.s32.f32 %v601_v51  ;;  %vm600_vm13 = vcmp.lt.f32.partialorder %v599_v57, 8388608.0 }
 0x24b   :  { %421 = vst [vmem:[#allocation2 + $0x30] sm:$0xff] %v590_v52  ;;  %v613_v56 = vor.u32 %v612_v54, %v611_v53 }
 0x24c   :  { %v603_v58 = vand.u32 2147483647, %v602_v55 }
 0x24d   :  { %v614_v60 = vsel %vm608_vm12, %v613_v56, %v404_v36 }
 0x24e   :  { %424 = vst [vmem:[#allocation2 + $0x48] sm:$0xff] %v614_v60  ;;  %v605_v61 = vor.u32 %v604_v59, %v603_v58 }
 0x250   :  { %v606_v62 = vsel %vm600_vm13, %v605_v61, %v403_v46 }
 0x251   :  { %423 = vst [vmem:[#allocation2 + $0x40] sm:$0xff] %v606_v62 }
 0x252   :  { %641 = shalt.err (!%p638_p4)
}
 0x253   :  { %s664_s17 = smov 128  }
 0x254   :  { %436 = dma.vmem_to_hbm [thread:$0]  %s431_s15, 1280, %s878_s8, [#allocation3], %s664_s17, %s664_s17, %s662_s13  }
 0x255   :  { %650 = dma.done.wait [#allocation3], 1280  }
 0x256   :  { %651 = vsyncadd [#allocation3], 4294966016 }
 0x257   :  { %440 = vsyncpa [#allocation3], 1 }

</bundles_post_ra>
